<compile_context>
chip_gen: v7x
topology: tpu7x:2x2x1
jax: 0.10.0
libtpu: 0.0.40
codegen_flags: <defaults>
</compile_context>

<pallas_src>
import functools

import numpy as np
import jax
import jax.numpy as jnp
from jax.experimental import pallas as pl
from jax.experimental.pallas import tpu as pltpu


def _cb_bce_partial_kernel(logits_ref, targets_ref, weight_ref, out_ref,
                           *, n_rows, tile_n):
    """Weighted, numerically-stable BCE-with-logits partial sums for one row tile."""
    x = logits_ref[...].astype(jnp.float32)      # (tile_n, C)
    y = targets_ref[...].astype(jnp.float32)     # (tile_n, C)
    w = weight_ref[...].astype(jnp.float32)      # (1, C) -> broadcast over rows

    # Stable per-element BCE with logits:
    #   l = max(x, 0) - x*y + log(1 + exp(-|x|))
    # exp/log1p go to the EUP slot; the rest is VPU.
    per_elem = jnp.maximum(x, 0.0) - x * y + jnp.log1p(jnp.exp(-jnp.abs(x)))
    weighted = per_elem * w                      # f32 accumulation throughout

    # Mask padded rows of the ragged last tile (garbage VMEM rows must not
    # contribute to the sum). Static Python branch: only emitted when needed.
    if n_rows % tile_n != 0:
        row0 = pl.program_id(0) * tile_n
        rows = row0 + jax.lax.broadcasted_iota(jnp.int32, weighted.shape, 0)
        weighted = jnp.where(rows < n_rows, weighted, 0.0)

    # Fold sublane groups: (tile_n, C) -> (tile_n//8, 8, C) -> sum over leading
    # axis. Tile-aligned reshape + cross-vreg adds (VPU only, no XLU reduce).
    c = weighted.shape[-1]
    partial = weighted.reshape(tile_n // 8, 8, c).sum(axis=0)   # (8, C) f32
    out_ref[0] = partial


def class_balanced_bce_with_logits(logits, targets, cb_weights, *,
                                   vmem_budget_bytes=16 * 1024 * 1024,
                                   max_tile_rows=None):
    """Class-balanced BCEWithLogitsLoss('mean') via a gridded Pallas kernel."""
    N, C = logits.shape
    assert targets.shape == (N, C)

    # Row-tile sizing: Pallas double-buffers each input -> 2 * tile_n * C bytes
    # per input array. Budget is conservative so the buffered working set plus
    # in-kernel f32 intermediates stay well under the v7x 64 MiB VMEM cap
    # (v5e/v6e have 128 MiB -> also fine).
    bytes_per_row = C * (jnp.dtype(logits.dtype).itemsize
                         + jnp.dtype(targets.dtype).itemsize)
    tile_n = vmem_budget_bytes // (2 * bytes_per_row)
    if max_tile_rows is not None:
        tile_n = min(tile_n, max_tile_rows)
    tile_n = min(tile_n, pl.cdiv(N, 8) * 8)      # never bigger than (padded) N
    tile_n = max(8, (tile_n // 8) * 8)           # multiple of 8 sublanes
    num_blocks = pl.cdiv(N, tile_n)

    w2d = cb_weights.reshape(1, C).astype(jnp.float32)

    kernel = functools.partial(_cb_bce_partial_kernel, n_rows=N, tile_n=tile_n)

    partials = pl.pallas_call(
        kernel,
        out_shape=jax.ShapeDtypeStruct((num_blocks, 8, C), jnp.float32),
        grid_spec=pltpu.PrefetchScalarGridSpec(
            num_scalar_prefetch=0,
            grid=(num_blocks,),
            in_specs=[
                pl.BlockSpec((tile_n, C), lambda i: (i, 0)),   # logits tile
                pl.BlockSpec((tile_n, C), lambda i: (i, 0)),   # targets tile
                pl.BlockSpec((1, C), lambda i: (0, 0)),        # cb weights (resident)
            ],
            out_specs=pl.BlockSpec((1, 8, C), lambda i: (i, 0, 0)),
        ),
        compiler_params=pltpu.CompilerParams(
            # independent row tiles: lets v7x shard the grid across both TCs
            dimension_semantics=("parallel",),
            vmem_limit_bytes=48 * 1024 * 1024,
        ),
    )(logits, targets, w2d)

    # Tiny epilogue reduction in XLA + divide by the *global* element count.
    return jnp.sum(partials) / jnp.float32(N * C)


def make_cb_weights(num_samples, beta=0.99):
    """Deterministic parameter setup matching ClassBalancedWrapper.__init__."""
    n = jnp.asarray(num_samples, dtype=jnp.float32)
    n_classes = n.shape[0]
    w = (1.0 - beta) / (1.0 - beta ** n)
    w = jnp.where(jnp.isinf(w), 0.0, w)          # cb_weights[isinf] = 0
    w = w / jnp.sum(w) * n_classes               # normalize: sum == n_classes
    return w


if __name__ == "__main__":
    N, C = 20, 128   # batch (non-multiple of 8 to exercise masking), num_classes
    beta = 0.99

    # deterministic "dataset class counts" (includes a 0 -> exercises inf->0 path)
    num_samples = np.concatenate([[0.0], np.arange(1, C, dtype=np.float32) * 7.0])
    cb_weights = make_cb_weights(num_samples, beta=beta)

    key = jax.random.PRNGKey(0)
    k1, k2 = jax.random.split(key)
    logits = jax.random.normal(k1, (N, C), dtype=jnp.float32)
    targets_f32 = jax.random.bernoulli(k2, 0.3, (N, C)).astype(jnp.float32)
    # targets are {0,1}: bf16 DMA is exact and halves target HBM traffic
    targets = targets_f32.astype(jnp.bfloat16)

    # pure-JAX reference (same math as torch BCEWithLogitsLoss w/ per-class weight)
    ref = jnp.mean(
        cb_weights[None, :]
        * (jnp.maximum(logits, 0.0) - logits * targets_f32
           + jnp.log1p(jnp.exp(-jnp.abs(logits))))
    )

    # 1) multi-block path: force tiny row tiles -> 3 grid steps + ragged tail mask
    loss_tiled = class_balanced_bce_with_logits(logits, targets, cb_weights,
                                                max_tile_rows=8)
    loss_tiled = jax.block_until_ready(loss_tiled)
    assert jnp.allclose(loss_tiled, ref, rtol=1e-5, atol=1e-5), (loss_tiled, ref)

    # 2) default path: VMEM-budget-derived tile (single block at this size)
    loss = class_balanced_bce_with_logits(logits, targets, cb_weights)
    loss = jax.block_until_ready(loss)
    assert jnp.allclose(loss, ref, rtol=1e-5, atol=1e-5), (loss, ref)

    print("KERNEL_OK")
</pallas_src>

<mosaic_0001>
module attributes {stable_mosaic.version = 11 : i64} {
  func.func @_cb_bce_partial_kernel(%arg0: i32, %arg1: memref<8x128xf32, #tpu.memory_space<vmem>>, %arg2: memref<8x128xbf16, #tpu.memory_space<vmem>>, %arg3: memref<1x128xf32, #tpu.memory_space<vmem>>, %arg4: memref<1x8x128xf32, #tpu.memory_space<vmem>>) attributes {dimension_semantics = [#tpu.dimension_semantics<parallel>], iteration_bounds = array<i64: 3>, scalar_prefetch = 0 : i64, scratch_operands = 0 : i64, tpu.core_type = #tpu.core_type<tc>, window_params = [{transform_indices = @transform_0, window_bounds = array<i64: 8, 128>}, {transform_indices = @transform_1, window_bounds = array<i64: 8, 128>}, {pipeline_mode = #tpu.pipeline_mode<synchronous>, transform_indices = @transform_2, window_bounds = array<i64: 1, 128>}, {transform_indices = @transform_3, window_bounds = array<i64: 1, 8, 128>}]} {
    %c0 = arith.constant 0 : index
    %c0_0 = arith.constant 0 : index
    %0 = vector.load %arg1[%c0, %c0_0] : memref<8x128xf32, #tpu.memory_space<vmem>>, vector<8x128xf32>
    %c0_1 = arith.constant 0 : index
    %c0_2 = arith.constant 0 : index
    %1 = vector.load %arg2[%c0_1, %c0_2] : memref<8x128xbf16, #tpu.memory_space<vmem>>, vector<8x128xbf16>
    %2 = arith.extf %1 : vector<8x128xbf16> to vector<8x128xf32>
    %c0_3 = arith.constant 0 : index
    %c0_4 = arith.constant 0 : index
    %3 = vector.load %arg3[%c0_3, %c0_4] : memref<1x128xf32, #tpu.memory_space<vmem>>, vector<1x128xf32>
    %cst = arith.constant 0.000000e+00 : f32
    %4 = vector.broadcast %cst : f32 to vector<8x128xf32>
    %5 = arith.maximumf %0, %4 : vector<8x128xf32>
    %6 = arith.mulf %0, %2 : vector<8x128xf32>
    %7 = arith.subf %5, %6 : vector<8x128xf32>
    %8 = math.absf %0 : vector<8x128xf32>
    %cst_5 = arith.constant 0.000000e+00 : f32
    %9 = vector.broadcast %cst_5 : f32 to vector<8x128xf32>
    %10 = arith.subf %9, %8 : vector<8x128xf32>
    %11 = math.exp %10 : vector<8x128xf32>
    %12 = math.log1p %11 : vector<8x128xf32>
    %13 = arith.addf %7, %12 : vector<8x128xf32>
    %14 = vector.broadcast %3 : vector<1x128xf32> to vector<8x128xf32>
    %15 = arith.mulf %13, %14 : vector<8x128xf32>
    %c8_i32 = arith.constant 8 : i32
    %16 = arith.muli %arg0, %c8_i32 : i32
    %17 = tpu.iota {dimensions = array<i32: 0>} : vector<8x128xi32>
    %18 = vector.broadcast %16 : i32 to vector<8x128xi32>
    %19 = arith.addi %18, %17 : vector<8x128xi32>
    %c20_i32 = arith.constant 20 : i32
    %20 = vector.broadcast %c20_i32 : i32 to vector<8x128xi32>
    %21 = arith.cmpi slt, %19, %20 : vector<8x128xi32>
    %cst_6 = arith.constant 0.000000e+00 : f32
    %22 = vector.broadcast %cst_6 : f32 to vector<8x128xf32>
    %23 = arith.select %21, %15, %22 : vector<8x128xi1>, vector<8x128xf32>
    %24 = vector.shape_cast %23 : vector<8x128xf32> to vector<1x8x128xf32>
    %cst_7 = arith.constant dense<0.000000e+00> : vector<8x128xf32>
    %25 = vector.multi_reduction <add>, %24, %cst_7 [0] : vector<1x8x128xf32> to vector<8x128xf32>
    %c0_8 = arith.constant 0 : index
    %c0_9 = arith.constant 0 : index
    %c0_10 = arith.constant 0 : index
    %26 = vector.load %arg4[%c0_8, %c0_9, %c0_10] : memref<1x8x128xf32, #tpu.memory_space<vmem>>, vector<1x8x128xf32>
    %27 = vector.shape_cast %26 : vector<1x8x128xf32> to vector<8x128xf32>
    %28 = vector.shape_cast %25 : vector<8x128xf32> to vector<1x8x128xf32>
    tpu.vector_store %arg4[%c0_8, %c0_9, %c0_10], %28 {strides = array<i32>} : memref<1x8x128xf32, #tpu.memory_space<vmem>>, vector<1x8x128xf32>,
    return
  }
  func.func @transform_0(%arg0: i32) -> (i32, i32) {
    %c0_i32 = arith.constant 0 : i32
    %c0_i32_0 = arith.constant 0 : i32
    return %arg0, %c0_i32 : i32, i32
  }
  func.func @transform_1(%arg0: i32) -> (i32, i32) {
    %c0_i32 = arith.constant 0 : i32
    %c0_i32_0 = arith.constant 0 : i32
    return %arg0, %c0_i32 : i32, i32
  }
  func.func @transform_2(%arg0: i32) -> (i32, i32) {
    %c0_i32 = arith.constant 0 : i32
    %c0_i32_0 = arith.constant 0 : i32
    %c0_i32_1 = arith.constant 0 : i32
    return %c0_i32, %c0_i32_0 : i32, i32
  }
  func.func @transform_3(%arg0: i32) -> (i32, i32, i32) {
    %c0_i32 = arith.constant 0 : i32
    %c0_i32_0 = arith.constant 0 : i32
    %c0_i32_1 = arith.constant 0 : i32
    return %arg0, %c0_i32, %c0_i32_0 : i32, i32, i32
  }
}

</mosaic_0001>

<bundles_post_ra>
// kernel: tpu_custom_call.1
= control target key start
LH: loop header
LB: loop body
LE: loop exit
PB: predicated region body
PF: predicated region fallthrough
CT: control target
= control target key end

     0   :  { %8 = vsyncpa [#allocation3], 0  ;;  %s804_s0 = inlined_call_operand.hbm [shape: f32[20,128], index: 0, kind: input, shape index: {}]   ;;  %s805_s1 = inlined_call_operand.hbm [shape: bf16[20,128], index: 1, kind: input, shape index: {}]   ;;  %s806_s2 = inlined_call_operand.vmem [shape: f32[1,128], index: 2, kind: input, shape index: {}]   ;;  %s807_s3 = inlined_call_operand.hbm [shape: f32[3,8,128], index: 3, kind: output, shape index: {}]  }
   0x1   :  { %10 = vsyncpa [#allocation3 + $0x1], 0 }
   0x2   :  { %11 = vsyncpa [#allocation6], 0 }
   0x3   :  { %13 = vsyncpa [#allocation6 + $0x1], 0 }
   0x4   :  { %14 = vsyncpa [#allocation4], 0 }
   0x5   :  { %16 = vsyncpa [#allocation4 + $0x1], 0  ;;  %s594_s12 = smov 0   ;;  %s596_s13 = smov 0  }
   0x6   :  { %s598_s14 = smov 0   ;;  %s600_s15 = smov 0  }
   0x7 LB: > { %s615_s16 = sadd.s32 4294967295, %s569_s15   ;;  %s367_s17 = sadd.s32 4294967294, %s569_s15   ;;  %s569_s15 = sphi %s600_s15, %s825_s15   ;;  %s565_s14 = sphi %s598_s14, %s824_s14   ;;  %s561_s13 = sphi %s596_s13, %s823_s13   ;;  %s557_s12 = sphi %s594_s12, %s822_s12  }
   0x8   : > { %s619_s18 = sadd.s32 1, %s569_s15   ;;  %s29_s19 = sadd.s32 1, %s565_s14 }
   0x9   : > { %s26_s20 = ssub.s32 %s569_s15, %s619_s18  ;;  %p36_p0 = scmp.ne.s32.totalorder %s565_s14, %s561_s13 }
   0xa   : > { %p27_p1 = scmp.eq.s32.totalorder %s26_s20, 0  ;;  %p37_p2 = scmp.eq.s32.totalorder %s569_s15, 0 }
   0xb   : > { %p42_p3 = scmp.ne.s32.totalorder %s561_s13, %s557_s12  ;;  %p43_p4 = scmp.eq.s32.totalorder %s615_s16, 0 }
   0xc   : > { %s631_s21 = scalar_select %p27_p1, %s565_s14, %s29_s19  }
   0xd   : > { %p633_p5 = por %p37_p2, %p36_p0  ;;  %p637_p6 = por %p43_p4, %p42_p3 }
   0xe   : > { %p113_p7 = scmp.eq.s32.totalorder %s615_s16, 2  ;;  %p119_p8 = scmp.eq.s32.totalorder %s367_s17, 2 }
   0xf   : > { %s811_s23 = scalar_select %p637_p6, 1, 0 }
  0x10   : > { %p401_p9 = scmp.lt.s32.totalorder %s569_s15, 3  ;;  %p643_p10 = por %p113_p7, %p36_p0 }
  0x11   : > { %p647_p11 = por %p119_p8, %p42_p3  ;;  %s652_s26 = sand.u32 1, %s565_s14  }
  0x12   : > { %s812_s24 = scalar_select %p643_p10, 1, 0 }
  0x13   : > { %s813_s25 = scalar_select %p647_p11, 1, 0 }
  0x14   : > { %s371_s27 = sshll.u32 %s569_s15, 7  ;;  %s370_s28 = sshll.u32 %s652_s26, 3 }
  0x15   : > { %s659_s4 = scalar_lea.hbm %s804_s0, %s371_s27  ;;  %s146_s5 = scalar_lea.vmem [#allocation2], %s370_s28 }
  0x16   : > { %s153_s6 = sshll.u32 %s146_s5, 4  ;;  %p663_p12 = pnand %p401_p9, %p633_p5  ;;  %s667_s6 = int_to_ptr.vmem [resolvable:$true] %s153_s6 }
  0x17   : > { %s143_s8 = scalar_lea.sflag [#allocation3], %s652_s26  ;;  %s439_s9 = scalar_lea.hbm %s659_s4, 128 }
  0x18   : > { %p440_p1 = scmp.ne.s32.totalorder %s659_s4, %s439_s9  ;;  %p441_p2 = pneg %p663_p12 }
  0x19   : > { %s444_s17 = scalar_lea.hbm %s804_s0, 384  ;;  %p445_p5 = scmp.lt.u32.totalorder %s659_s4, %s804_s0 }
  0x1a   : > { %p442_p3 = pnand %p441_p2, %p440_p1  ;;  %p446_p7 = scmp.lt.u32.totalorder %s444_s17, %s439_s9 }
  0x1b   : > { %p448_p9 = scmp.lt.u32.totalorder %s439_s9, %s659_s4 }
  0x1c   : > { %p443_p4 = pneg %p442_p3  ;;  %p447_p8 = por %p446_p7, %p445_p5 }
  0x1e   : > { %p449_p13 = por %p448_p9, %p447_p8 }
  0x20   : > { %p450_p0 = pnand %p449_p13, %p443_p4 }
  0x22   : > { %453 = shalt.err (!%p450_p0)
}
  0x23   : > { %s454_s22 = scalar_lea.vmem %s667_s6, 128  ;;  %s571_s27 = smov [#allocation2]  }
  0x24   : > { %p455_p1 = scmp.ne.s32.totalorder %s667_s6, %s454_s22  ;;  %s459_s28 = sshll.u32 %s571_s27, 4  ;;  %s460_s28 = int_to_ptr.vmem [resolvable:$false] %s459_s28 }
  0x25   : > { %s461_s29 = scalar_lea.vmem %s460_s28, 256  ;;  %p462_p10 = scmp.lt.s32.totalorder %s667_s6, %s460_s28 }
  0x26   : > { %p457_p3 = pnand %p455_p1, %p441_p2  ;;  %p463_p5 = scmp.lt.s32.totalorder %s461_s29, %s454_s22 }
  0x28   : > { %p458_p11 = pneg %p457_p3  ;;  %p464_p7 = por %p463_p5, %p462_p10 }
  0x2a   : > { %p465_p8 = pnand %p464_p7, %p458_p11 }
  0x2c   : > { %468 = shalt.err (!%p465_p8)
}
  0x2d   : > { %393 = dma.hbm_to_vmem [thread:$0]  (!%p663_p12), %s659_s4, 128, %s667_s6, %s143_s8  }
  0x2e   : > { %p815_p13 = scmp.lt.s32.totalorder %s569_s15, 4  ;;  %p816_p0 = scmp.ge.s32.totalorder %s569_s15, 1 }
  0x2f   : > { %s372_s5 = sshll.u32 %s652_s26, 2  ;;  %s373_s9 = sshll.u32 %s569_s15, 6 }
  0x30   : > { %p701_p4 = pnand %p816_p0, %p815_p13  ;;  %s710_s17 = scalar_lea.hbm %s805_s1, %s373_s9 }
  0x31   : > { %s164_s19 = scalar_lea.vmem [#allocation5], %s372_s5  ;;  %s161_s4 = scalar_lea.sflag [#allocation6], %s652_s26 }
  0x32   : > { %s817_s30 = scalar_select %p701_p4, 1, 0 }
  0x33   : > { %s171_s20 = sshll.u32 %s164_s19, 4  ;;  %s469_s6 = scalar_lea.hbm %s710_s17, 64  ;;  %s172_s20 = int_to_ptr.vmem [resolvable:$true] %s171_s20 }
  0x34   : > { %p470_p10 = scmp.ne.s32.totalorder %s710_s17, %s469_s6  ;;  %s474_s27 = scalar_lea.hbm %s805_s1, 192 }
  0x35   : > { %p475_p1 = scmp.lt.u32.totalorder %s710_s17, %s805_s1  ;;  %p476_p3 = scmp.lt.u32.totalorder %s474_s27, %s469_s6 }
  0x36   : > { %p472_p11 = pnand %p470_p10, %p441_p2  ;;  %p478_p7 = scmp.lt.u32.totalorder %s469_s6, %s710_s17 }
  0x37   : > { %p477_p5 = por %p476_p3, %p475_p1 }
  0x38   : > { %p473_p9 = pneg %p472_p11 }
  0x39   : > { %p479_p8 = por %p478_p7, %p477_p5 }
  0x3b   : > { %p480_p13 = pnand %p479_p8, %p473_p9 }
  0x3d   : > { %483 = shalt.err (!%p480_p13)
}
  0x3e   : > { %s484_s26 = scalar_lea.vmem %s172_s20, 64  ;;  %s572_s5 = smov [#allocation5]  }
  0x3f   : > { %p485_p0 = scmp.ne.s32.totalorder %s172_s20, %s484_s26  ;;  %s489_s9 = sshll.u32 %s572_s5, 4  ;;  %s490_s9 = int_to_ptr.vmem [resolvable:$false] %s489_s9 }
  0x40   : > { %s491_s10 = scalar_lea.vmem %s490_s9, 128  ;;  %p492_p6 = scmp.lt.s32.totalorder %s172_s20, %s490_s9 }
  0x41   : > { %p487_p10 = pnand %p485_p0, %p441_p2  ;;  %p493_p4 = scmp.lt.s32.totalorder %s491_s10, %s484_s26 }
  0x43   : > { %p488_p11 = pneg %p487_p10  ;;  %p494_p1 = por %p493_p4, %p492_p6 }
  0x45   : > { %p495_p3 = pnand %p494_p1, %p488_p11 }
  0x47   : > { %498 = shalt.err (!%p495_p3)
}
  0x48   : > { %396 = dma.hbm_to_vmem [thread:$0]  (!%p663_p12), %s710_s17, 64, %s172_s20, %s161_s4  }
  0x49   : > { %p818_p9 = scmp.ne.s32.totalorder %s817_s30, 0 }
  0x4a   : > { %s735_s11 = sand.u32 (!%p818_p9), 1, %s561_s13   ;;  %p819_p6 = scmp.ne.s32.totalorder (!%p818_p9), %s811_s23, 0 }
  0x4b   : > { %180 = sbr.rel (%p818_p9) target bundleno = 139 (0x8b), region = 32  ;;  %s375_s19 = sshll.u32 (!%p818_p9), %s735_s11, 3 }
  0x4c   : > { %s183_s6 = scalar_lea.sflag (!%p818_p9), [#allocation3], %s735_s11  ;;  %s186_s8 = scalar_lea.vmem (!%p818_p9), [#allocation2], %s375_s19 }
  0x52   : > { %544 = dma.done.wait (%p819_p6), %s183_s6, 128  }
  0x53   : > { %546 = vsyncadd (%p819_p6), %s183_s6, 4294967168  ;;  %s376_s7 = sshll.u32 %s735_s11, 2  ;;  %s192_s30 = scalar_lea.sflag [#allocation6], %s735_s11 }
  0x54   : > { %s195_s17 = scalar_lea.vmem [#allocation5], %s376_s7 }
  0x55   : > { %548 = dma.done.wait (%p819_p6), %s192_s30, 64  }
  0x56   : > { %550 = vsyncadd (%p819_p6), %s192_s30, 4294967232  ;;  %v223_v0 = vld [vmem:[%s186_s8] sm:$0xff]  ;;  %v224_v6 = vld [vmem:[%s195_s17] sm:$0xf]  ;;  %v252_v9 = vlaneseq  ;;  %s379_s20 = sshll.u32 %s615_s16, 3  ;;  %s222_s22 = scalar_lea.vmem [#allocation7], %s375_s19 }
  0x57   : > { %v230_v1 = vand.u32 2147483647, %v223_v0  ;;  %v225_v8 = vunpack.c.l.bf16 %v224_v6  ;;  %v227_v11 = vmax.f32 %v223_v0, 0.0  ;;  %v254_v15 = vstv %s379_s20  ;;  %v378_v21 = vld [vmem:[%s806_s2] ss:$0 sm:$0xff]  ;;  %s274_s27 = sshll.u32 %s222_s22, 4  ;;  %s758_s27 = int_to_ptr.vmem [resolvable:$true] %s274_s27 }
  0x58   : > { %v253_v14 = vshrl.u32 %v252_v9, 7  ;;  %s381_s28 = sshll.u32 %s615_s16, 7  ;;  %s261_s9 = scalar_lea.sflag [#allocation4], %s735_s11 }
  0x59   : > { %v231_v2 = vsub.f32 0.0, %v230_v1  ;;  %v228_v12 = vmul.f32 %v225_v8, %v223_v0  ;;  %s763_s5 = scalar_lea.hbm %s807_s3, %s381_s28  ;;  %s499_s10 = scalar_lea.vmem %s758_s27, 128 }
  0x5a   : > { %v255_v20 = vadd.s32 %v254_v15, %v253_v14  ;;  %p500_p12 = scmp.ne.s32.totalorder %s758_s27, %s499_s10  ;;  %p820_p2 = scmp.ne.s32.totalorder %s812_s24, 0 }
  0x5b   : > { %v232_v3 = vmul.f32 1.442695, %v231_v2  ;;  %v229_v18 = vsub.f32 %v227_v11, %v228_v12  ;;  %s573_s16 = smov [#allocation7]  }
  0x5c   : > { %vm256_vm1 = vcmp.lt.s32.totalorder %v255_v20, 20  ;;  %p501_p4 = pnand %p500_p12, %p820_p2  ;;  %s503_s19 = sshll.u32 %s573_s16, 4  ;;  %s504_s19 = int_to_ptr.vmem [resolvable:$false] %s503_s19 }
  0x5d   : > { %435 = vpow2.f32 %v232_v3  ;;  %s505_s6 = scalar_lea.vmem %s504_s19, 256  ;;  %p506_p7 = scmp.lt.s32.totalorder %s758_s27, %s504_s19 }
  0x5e   : > { %p502_p5 = pneg %p501_p4  ;;  %p507_p8 = scmp.lt.s32.totalorder %s505_s6, %s499_s10 }
  0x60   : > { %p508_p13 = por %p507_p8, %p506_p7 }
  0x62   : > { %p509_p0 = pnand %p508_p13, %p502_p5 }
  0x67   : > { %v436_v4 = vpop.eup %435 }
  0x68   : > { %v234_v5 = vadd.f32 1.0, %v436_v4  ;;  %v237_v7 = vmul.f32 -0.5, %v436_v4  ;;  %v240_v13 = vand.u32 2147483647, %v436_v4 }
  0x6a   : > { %437 = vlog2.f32 %v234_v5  ;;  %v238_v10 = vadd.f32 1.0, %v237_v7  ;;  %vm241_vm0 = vcmp.lt.f32.partialorder %v240_v13, 0.0004427343 }
  0x6c   : > { %v239_v16 = vmul.f32 %v436_v4, %v238_v10 }
  0x74   : > { %v438_v17 = vpop.eup %437 }
  0x75   : > { %v236_v19 = vmul.f32 0.6931472, %v438_v17 }
  0x77   : > { %v242_v22 = vsel %vm241_vm0, %v239_v16, %v236_v19 }
  0x78   : > { %v243_v23 = vadd.f32 %v242_v22, %v229_v18 }
  0x7a   : > { %v250_v24 = vmul.f32 %v378_v21, %v243_v23 }
  0x7c   : > { %v257_v25 = vsel %vm256_vm1, %v250_v24, 0.0 }
  0x7d   : > { %259 = vst [vmem:[%s222_s22] sm:$0xff] %v257_v25 }
  0x7e   : > { %512 = shalt.err (!%p509_p0)
}
  0x7f   : > { %s513_s11 = scalar_lea.hbm %s763_s5, 128  ;;  %s517_s30 = scalar_lea.hbm %s807_s3, 384 }
  0x80   : > { %p514_p10 = scmp.ne.s32.totalorder %s763_s5, %s513_s11  ;;  %p518_p3 = scmp.lt.u32.totalorder %s763_s5, %s807_s3 }
  0x81   : > { %p519_p9 = scmp.lt.u32.totalorder %s517_s30, %s513_s11  ;;  %p521_p12 = scmp.lt.u32.totalorder %s513_s11, %s763_s5 }
  0x82   : > { %p515_p11 = pnand %p514_p10, %p820_p2 }
  0x83   : > { %p520_p6 = por %p519_p9, %p518_p3 }
  0x84   : > { %p516_p1 = pneg %p515_p11 }
  0x85   : > { %p522_p4 = por %p521_p12, %p520_p6 }
  0x87   : > { %p523_p5 = pnand %p522_p4, %p516_p1 }
  0x89   : > { %526 = shalt.err (!%p523_p5)
}
  0x8a   : > { %388 = dma.vmem_to_hbm [thread:$0]  (%p820_p2), %s758_s27, 128, %s763_s5, %s261_s9  }
  0x8b PF: > { %p402_p7 = scmp.ge.s32.totalorder %s569_s15, 2  ;;  %s286_s23 = sand.u32 1, %s557_s12  }
  0x8c   : > { %p821_p8 = scmp.ne.s32.totalorder %s813_s25, 0  ;;  %s287_s4 = scalar_lea.sflag [#allocation4], %s286_s23 }
  0x8e   : > { %p398_p13 = pnand %p402_p7, %p821_p8 }
  0x90   : > { %552 = dma.done.wait (!%p398_p13), %s287_s4, 128  }
  0x91   : > { %554 = vsyncadd (!%p398_p13), %s287_s4, 4294967168  ;;  %p19_p0 = scmp.ge.s32.totalorder %s619_s18, 5   ;;  %s822_s12 = smov %s561_s13 }
  0x92   : > { %s823_s13 = smov %s565_s14  ;;  %s824_s14 = smov %s631_s21 }
  0x93   : > { %s825_s15 = smov %s619_s18  ;;  %21 = sbr.rel (!%p19_p0) target bundleno = 7 (0x7), region = 90 }
  0x9a   :  { %292 = vsyncpa [#allocation3], 1 }
  0x9b   :  { %294 = vsyncpa [#allocation3 + $0x1], 1 }
  0x9c   :  { %295 = vsyncpa [#allocation6], 1 }
  0x9d   :  { %297 = vsyncpa [#allocation6 + $0x1], 1 }
  0x9e   :  { %298 = vsyncpa [#allocation4], 1 }
  0x9f   :  { %300 = vsyncpa [#allocation4 + $0x1], 1 }

</bundles_post_ra>
